<compile_context>
chip_gen: v5e
topology: v5e:2x2
jax: 0.10.0
libtpu: 0.0.40
codegen_flags: <defaults>
</compile_context>

<pallas_src>
import math
import functools

import numpy as np
import jax
import jax.numpy as jnp
from jax.experimental import pallas as pl
from jax.experimental.pallas import tpu as pltpu

EPS = 1e-5


def _round_up(x, m):
    return (x + m - 1) // m * m


def _convrelu_kernel(x_ref, w_ref, factor_ref, sbias_ref, mask_ref, out_ref,
                     *, B, K, Wp, Lc, Lx, inv_hw):
    # x_ref      : (B, Cin, Lx)      bf16  flattened zero-padded images (lanes = spatial)
    # w_ref      : (Cout, K*K*Cin)   bf16  packed conv weight (tap-major, cin-minor cols)
    # factor_ref : (B, Cout, 1)      f32   precomputed style scale
    # sbias_ref  : (B, Cout, 1)      f32   precomputed style shift
    # mask_ref   : (1, 1, Lc)        f32   1.0 at valid output lanes, else 0.0
    # out_ref    : (B, Cout, Lc)     f32
    w = w_ref[...]                                    # (Cout, K*K*Cin) bf16
    x32 = x_ref[...].astype(jnp.float32)              # (B, Cin, Lx), rolls on 32-bit lanes

    # --- implicit im2col in VMEM/vregs: one XLU roll + aligned take per tap ---
    taps = []
    for kh in range(K):
        for kw in range(K):
            d = kh * Wp + kw                          # static lane offset of this tap
            if d == 0:
                shifted = x32
            else:
                # left-shift by d: roll moves data toward higher lanes, so a
                # roll of (Lx - d) places x[..., i + d] at lane i (no wrap for
                # i < Lc because Lx >= Lc + d_max).
                shifted = pltpu.roll(x32, Lx - d, axis=2)
            taps.append(shifted[:, :, :Lc])           # (B, Cin, Lc), lane-aligned take
    operand = jnp.concatenate(taps, axis=1).astype(jnp.bfloat16)   # (B, K*K*Cin, Lc)

    # --- one MXU contraction per image over all taps & input channels ---
    conv = jnp.stack(
        [jnp.dot(w, operand[b], preferred_element_type=jnp.float32)
         for b in range(B)],
        axis=0)                                       # (B, Cout, Lc) f32
    # NOTE: conv bias intentionally omitted — InstanceNorm's mean subtraction
    # cancels any per-channel constant exactly.

    # --- InstanceNorm2d over valid lanes only, fused single masked pass ---
    mask = mask_ref[...]                              # (1, 1, Lc)
    cm = conv * mask
    s1 = jnp.sum(cm, axis=-1, keepdims=True)          # (B, Cout, 1)
    s2 = jnp.sum(cm * conv, axis=-1, keepdims=True)   # sum of conv^2 over valid lanes
    mean = s1 * inv_hw
    var = jnp.maximum(s2 * inv_hw - mean * mean, 0.0)
    norm = (conv - mean) * jax.lax.rsqrt(var + EPS)

    # --- AdaIn modulation + ReLU ---
    res = norm * factor_ref[...] + sbias_ref[...]
    out_ref[...] = jnp.maximum(res, 0.0).astype(out_ref.dtype)


def convrelu_forward(x_nchw, latent_w, wconv, bconv, wsty, bsty,
                     *, stride, padding, images_per_step=8,
                     out_dtype=jnp.float32):
    """x_nchw: (N, Cin, H, W); latent_w: (N, dim_latent). Returns NCHW f32.

    `bconv` is accepted for interface parity with the PyTorch module but is not
    used: InstanceNorm cancels per-channel constants, so it has no effect.
    """
    del bconv  # mathematically a no-op under InstanceNorm
    N, Cin, H, W = x_nchw.shape
    Cout, _, K, _ = wconv.shape
    dim_latent = latent_w.shape[1]

    Hp, Wp = H + 2 * padding, W + 2 * padding
    Ho = (H + 2 * padding - K) // stride + 1
    Wo = (W + 2 * padding - K) // stride + 1
    HW = Ho * Wo
    d_max = (K - 1) * Wp + (K - 1)          # largest tap lane offset
    Lc = _round_up(Hp * Wp, 128)            # lane-dense compute length
    Lx = _round_up(Lc + d_max, 128)         # input lanes: every rolled take is wrap-free

    # batch B images per grid step to amortize the fixed per-step overhead
    B = max(1, min(N, images_per_step))
    N_pad = _round_up(N, B)
    n_steps = N_pad // B

    # --- input: pad spatially, flatten spatial onto the lane axis, bf16 stream
    x_pad = jnp.pad(x_nchw, ((0, N_pad - N), (0, 0),
                             (padding, padding), (padding, padding)))
    x_flat = x_pad.reshape(N_pad, Cin, Hp * Wp)
    x_flat = jnp.pad(x_flat, ((0, 0), (0, 0), (0, Lx - Hp * Wp))).astype(jnp.bfloat16)

    # --- conv weight as one packed tile (Cout, K*K*Cin): col = (kh*K+kw)*Cin + c
    KKC = K * K * Cin
    w_packed = jnp.transpose(wconv, (0, 2, 3, 1)).reshape(Cout, KKC).astype(jnp.bfloat16)

    # --- style affine hoisted out of the kernel (SLinear with ScaleW scaling)
    style_scale = math.sqrt(2.0 / dim_latent)
    style = (latent_w.astype(jnp.float32)
             @ (wsty.astype(jnp.float32).T * style_scale)
             + bsty.astype(jnp.float32))                     # (N, 2*Cout)
    factor = jnp.pad(style[:, :Cout].reshape(N, Cout, 1),
                     ((0, N_pad - N), (0, 0), (0, 0)))
    sbias = jnp.pad(style[:, Cout:].reshape(N, Cout, 1),
                    ((0, N_pad - N), (0, 0), (0, 0)))

    # --- validity mask over the padded/rounded lane axis (host-side, static)
    idx = np.arange(Lc)
    ii, jj = idx // Wp, idx % Wp
    valid = ((idx < Hp * Wp)
             & (ii % stride == 0) & (ii // stride < Ho)
             & (jj % stride == 0) & (jj // stride < Wo))
    mask = jnp.asarray(valid.astype(np.float32)).reshape(1, 1, Lc)

    kernel = functools.partial(_convrelu_kernel, B=B, K=K, Wp=Wp, Lc=Lc, Lx=Lx,
                               inv_hw=1.0 / HW)

    cost = pl.CostEstimate(
        flops=2 * N_pad * Cout * KKC * Lc,
        transcendentals=N_pad * Cout,
        bytes_accessed=int(x_flat.size * 2 + w_packed.size * 2
                           + (factor.size + sbias.size + mask.size) * 4
                           + N_pad * Cout * Lc * jnp.dtype(out_dtype).itemsize))

    out = pl.pallas_call(
        kernel,
        out_shape=jax.ShapeDtypeStruct((N_pad, Cout, Lc), out_dtype),
        grid_spec=pltpu.PrefetchScalarGridSpec(
            num_scalar_prefetch=0,
            grid=(n_steps,),
            in_specs=[
                pl.BlockSpec((B, Cin, Lx), lambda n: (n, 0, 0)),     # padded images
                pl.BlockSpec((Cout, KKC), lambda n: (0, 0)),         # packed weights
                pl.BlockSpec((B, Cout, 1), lambda n: (n, 0, 0)),     # style factor
                pl.BlockSpec((B, Cout, 1), lambda n: (n, 0, 0)),     # style bias
                pl.BlockSpec((1, 1, Lc), lambda n: (0, 0, 0)),       # valid mask
            ],
            out_specs=pl.BlockSpec((B, Cout, Lc), lambda n: (n, 0, 0)),
        ),
        compiler_params=pltpu.CompilerParams(
            dimension_semantics=("parallel",),
            # Working set here is tiny; 32 MiB is safe on every generation
            # (v7x has only 64 MiB/TC physical). Raise when spatial tiling lands
            # on v5e/v6e to use larger lane tiles.
            vmem_limit_bytes=32 * 1024 * 1024),
        cost_estimate=cost,
    )(x_flat, w_packed, factor, sbias, mask)

    # --- extract valid spatial positions: already NCHW, no transpose needed ---
    out_sp = out[:N, :, :Hp * Wp].astype(jnp.float32).reshape(N, Cout, Hp, Wp)
    return out_sp[:, :, ::stride, ::stride][:, :, :Ho, :Wo]


def _reference(x_nchw, latent_w, wconv, bconv, wsty, bsty, *, stride, padding):
    """Pure-JAX reference. Conv operands cast to bf16 to mirror the kernel's MXU
    input dtype (accumulation and all other math stay f32); everything else
    follows the PyTorch module exactly (biased var, eps=1e-5, ScaleW scaling)."""
    dim_latent = latent_w.shape[1]
    Cout = wconv.shape[0]
    conv = jax.lax.conv_general_dilated(
        x_nchw.astype(jnp.bfloat16), wconv.astype(jnp.bfloat16),
        window_strides=(stride, stride),
        padding=[(padding, padding), (padding, padding)],
        dimension_numbers=("NCHW", "OIHW", "NCHW"),
        preferred_element_type=jnp.float32)
    conv = conv + bconv.reshape(1, Cout, 1, 1)
    style = latent_w @ (wsty * math.sqrt(2.0 / dim_latent)).T + bsty   # (N, 2C)
    factor = style[:, :Cout][:, :, None, None]
    sbias = style[:, Cout:][:, :, None, None]
    mean = jnp.mean(conv, axis=(2, 3), keepdims=True)
    var = jnp.mean((conv - mean) ** 2, axis=(2, 3), keepdims=True)
    norm = (conv - mean) * jax.lax.rsqrt(var + EPS)
    return jnp.maximum(norm * factor + sbias, 0.0)


if __name__ == "__main__":
    # module config: convrelu(in_channel=4, out_channel=8, kernel=3,
    #                         stride=1, padding=1, dim_latent=32, act_func=ReLU)
    N, Cin, H, W = 2, 4, 16, 16
    Cout, K, stride, padding = 8, 3, 1, 1
    dim_latent = 32

    key = jax.random.PRNGKey(0)
    k1, k2, k3, k4, k5 = jax.random.split(key, 5)

    x = jax.random.normal(k1, (N, Cin, H, W), dtype=jnp.float32)
    latent_w = jax.random.normal(k2, (N, dim_latent), dtype=jnp.float32)

    # Conv2d params (deterministic synthetic init)
    wconv = jax.random.normal(k3, (Cout, Cin, K, K), dtype=jnp.float32) * 0.1
    bconv = jax.random.normal(k4, (Cout,), dtype=jnp.float32) * 0.1

    # FC_A / SLinear params: weight ~ normal, bias[:C]=1, bias[C:]=0
    wsty = jax.random.normal(k5, (2 * Cout, dim_latent), dtype=jnp.float32)
    bsty = jnp.concatenate([jnp.ones((Cout,), jnp.float32),
                            jnp.zeros((Cout,), jnp.float32)])

    out = convrelu_forward(x, latent_w, wconv, bconv, wsty, bsty,
                           stride=stride, padding=padding)
    out = jax.block_until_ready(out)

    ref = _reference(x, latent_w, wconv, bconv, wsty, bsty,
                     stride=stride, padding=padding)
    assert out.shape == (N, Cout, H, W)
    assert jnp.allclose(out, ref, atol=2e-3, rtol=2e-3), "mismatch vs reference"

    print("KERNEL_OK")
</pallas_src>

<mosaic_0001>
module attributes {stable_mosaic.version = 11 : i64} {
  func.func @_convrelu_kernel(%arg0: i32, %arg1: memref<2x4x512xbf16, #tpu.memory_space<vmem>>, %arg2: memref<8x36xbf16, #tpu.memory_space<vmem>>, %arg3: memref<2x8x1xf32, #tpu.memory_space<vmem>>, %arg4: memref<2x8x1xf32, #tpu.memory_space<vmem>>, %arg5: memref<1x1x384xf32, #tpu.memory_space<vmem>>, %arg6: memref<2x8x384xf32, #tpu.memory_space<vmem>>) attributes {dimension_semantics = [#tpu.dimension_semantics<parallel>], iteration_bounds = array<i64: 1>, scalar_prefetch = 0 : i64, scratch_operands = 0 : i64, tpu.core_type = #tpu.core_type<tc>, window_params = [{transform_indices = @transform_0, window_bounds = array<i64: 2, 4, 512>}, {pipeline_mode = #tpu.pipeline_mode<synchronous>, transform_indices = @transform_1, window_bounds = array<i64: 8, 36>}, {transform_indices = @transform_2, window_bounds = array<i64: 2, 8, 1>}, {transform_indices = @transform_3, window_bounds = array<i64: 2, 8, 1>}, {pipeline_mode = #tpu.pipeline_mode<synchronous>, transform_indices = @transform_4, window_bounds = array<i64: 1, 1, 384>}, {transform_indices = @transform_5, window_bounds = array<i64: 2, 8, 384>}]} {
    %c0 = arith.constant 0 : index
    %c0_0 = arith.constant 0 : index
    %0 = vector.load %arg2[%c0, %c0_0] : memref<8x36xbf16, #tpu.memory_space<vmem>>, vector<8x36xbf16>
    %c0_1 = arith.constant 0 : index
    %c0_2 = arith.constant 0 : index
    %c0_3 = arith.constant 0 : index
    %1 = vector.load %arg1[%c0_1, %c0_2, %c0_3] : memref<2x4x512xbf16, #tpu.memory_space<vmem>>, vector<2x4x512xbf16>
    %2 = arith.extf %1 : vector<2x4x512xbf16> to vector<2x4x512xf32>
    %3 = vector.extract_strided_slice %2 {offsets = [0, 0, 0], sizes = [2, 4, 384], strides = [1, 1, 1]} : vector<2x4x512xf32> to vector<2x4x384xf32>
    %c511_i32 = arith.constant 511 : i32
    %4 = tpu.dynamic_rotate %2 by %c511_i32 dim 2 : vector<2x4x512xf32>, i32 -> vector<2x4x512xf32>
    %5 = vector.extract_strided_slice %4 {offsets = [0, 0, 0], sizes = [2, 4, 384], strides = [1, 1, 1]} : vector<2x4x512xf32> to vector<2x4x384xf32>
    %c510_i32 = arith.constant 510 : i32
    %6 = tpu.dynamic_rotate %2 by %c510_i32 dim 2 : vector<2x4x512xf32>, i32 -> vector<2x4x512xf32>
    %7 = vector.extract_strided_slice %6 {offsets = [0, 0, 0], sizes = [2, 4, 384], strides = [1, 1, 1]} : vector<2x4x512xf32> to vector<2x4x384xf32>
    %c494_i32 = arith.constant 494 : i32
    %8 = tpu.dynamic_rotate %2 by %c494_i32 dim 2 : vector<2x4x512xf32>, i32 -> vector<2x4x512xf32>
    %9 = vector.extract_strided_slice %8 {offsets = [0, 0, 0], sizes = [2, 4, 384], strides = [1, 1, 1]} : vector<2x4x512xf32> to vector<2x4x384xf32>
    %c493_i32 = arith.constant 493 : i32
    %10 = tpu.dynamic_rotate %2 by %c493_i32 dim 2 : vector<2x4x512xf32>, i32 -> vector<2x4x512xf32>
    %11 = vector.extract_strided_slice %10 {offsets = [0, 0, 0], sizes = [2, 4, 384], strides = [1, 1, 1]} : vector<2x4x512xf32> to vector<2x4x384xf32>
    %c492_i32 = arith.constant 492 : i32
    %12 = tpu.dynamic_rotate %2 by %c492_i32 dim 2 : vector<2x4x512xf32>, i32 -> vector<2x4x512xf32>
    %13 = vector.extract_strided_slice %12 {offsets = [0, 0, 0], sizes = [2, 4, 384], strides = [1, 1, 1]} : vector<2x4x512xf32> to vector<2x4x384xf32>
    %c476_i32 = arith.constant 476 : i32
    %14 = tpu.dynamic_rotate %2 by %c476_i32 dim 2 : vector<2x4x512xf32>, i32 -> vector<2x4x512xf32>
    %15 = vector.extract_strided_slice %14 {offsets = [0, 0, 0], sizes = [2, 4, 384], strides = [1, 1, 1]} : vector<2x4x512xf32> to vector<2x4x384xf32>
    %c475_i32 = arith.constant 475 : i32
    %16 = tpu.dynamic_rotate %2 by %c475_i32 dim 2 : vector<2x4x512xf32>, i32 -> vector<2x4x512xf32>
    %17 = vector.extract_strided_slice %16 {offsets = [0, 0, 0], sizes = [2, 4, 384], strides = [1, 1, 1]} : vector<2x4x512xf32> to vector<2x4x384xf32>
    %c474_i32 = arith.constant 474 : i32
    %18 = tpu.dynamic_rotate %2 by %c474_i32 dim 2 : vector<2x4x512xf32>, i32 -> vector<2x4x512xf32>
    %19 = vector.extract_strided_slice %18 {offsets = [0, 0, 0], sizes = [2, 4, 384], strides = [1, 1, 1]} : vector<2x4x512xf32> to vector<2x4x384xf32>
    %20 = tpu.concatenate %3, %5, %7, %9, %11, %13, %15, %17, %19 in 1 : vector<2x4x384xf32>, vector<2x4x384xf32>, vector<2x4x384xf32>, vector<2x4x384xf32>, vector<2x4x384xf32>, vector<2x4x384xf32>, vector<2x4x384xf32>, vector<2x4x384xf32>, vector<2x4x384xf32> -> vector<2x36x384xf32>
    %21 = arith.truncf %20 : vector<2x36x384xf32> to vector<2x36x384xbf16>
    %22 = vector.extract_strided_slice %21 {offsets = [0, 0, 0], sizes = [1, 36, 384], strides = [1, 1, 1]} : vector<2x36x384xbf16> to vector<1x36x384xbf16>
    %23 = vector.shape_cast %22 : vector<1x36x384xbf16> to vector<36x384xbf16>
    %cst = arith.constant dense<0.000000e+00> : vector<8x384xf32>
    %24 = tpu.matmul %0, %23, %cst {dimension_numbers = #tpu.dot_dimension_numbers<[1], [0], [0], [1], [0, 0, 1, 1], [], []>} : vector<8x36xbf16>, vector<36x384xbf16>, vector<8x384xf32> -> vector<8x384xf32>
    %25 = vector.extract_strided_slice %21 {offsets = [1, 0, 0], sizes = [1, 36, 384], strides = [1, 1, 1]} : vector<2x36x384xbf16> to vector<1x36x384xbf16>
    %26 = vector.shape_cast %25 : vector<1x36x384xbf16> to vector<36x384xbf16>
    %cst_4 = arith.constant dense<0.000000e+00> : vector<8x384xf32>
    %27 = tpu.matmul %0, %26, %cst_4 {dimension_numbers = #tpu.dot_dimension_numbers<[1], [0], [0], [1], [0, 0, 1, 1], [], []>} : vector<8x36xbf16>, vector<36x384xbf16>, vector<8x384xf32> -> vector<8x384xf32>
    %28 = vector.shape_cast %24 : vector<8x384xf32> to vector<1x8x384xf32>
    %29 = vector.shape_cast %27 : vector<8x384xf32> to vector<1x8x384xf32>
    %30 = tpu.concatenate %28, %29 in 0 : vector<1x8x384xf32>, vector<1x8x384xf32> -> vector<2x8x384xf32>
    %c0_5 = arith.constant 0 : index
    %c0_6 = arith.constant 0 : index
    %c0_7 = arith.constant 0 : index
    %31 = vector.load %arg5[%c0_5, %c0_6, %c0_7] : memref<1x1x384xf32, #tpu.memory_space<vmem>>, vector<1x1x384xf32>
    %32 = vector.broadcast %31 : vector<1x1x384xf32> to vector<2x8x384xf32>
    %33 = arith.mulf %30, %32 : vector<2x8x384xf32>
    %cst_8 = arith.constant dense<0.000000e+00> : vector<2x8xf32>
    %34 = vector.multi_reduction <add>, %33, %cst_8 [2] : vector<2x8x384xf32> to vector<2x8xf32>
    %35 = vector.shape_cast %34 : vector<2x8xf32> to vector<2x8x1xf32>
    %36 = arith.mulf %33, %30 : vector<2x8x384xf32>
    %cst_9 = arith.constant dense<0.000000e+00> : vector<2x8xf32>
    %37 = vector.multi_reduction <add>, %36, %cst_9 [2] : vector<2x8x384xf32> to vector<2x8xf32>
    %38 = vector.shape_cast %37 : vector<2x8xf32> to vector<2x8x1xf32>
    %cst_10 = arith.constant 3.906250e-03 : f32
    %39 = vector.broadcast %cst_10 : f32 to vector<2x8x1xf32>
    %40 = arith.mulf %35, %39 : vector<2x8x1xf32>
    %cst_11 = arith.constant 3.906250e-03 : f32
    %41 = vector.broadcast %cst_11 : f32 to vector<2x8x1xf32>
    %42 = arith.mulf %38, %41 : vector<2x8x1xf32>
    %43 = arith.mulf %40, %40 : vector<2x8x1xf32>
    %44 = arith.subf %42, %43 : vector<2x8x1xf32>
    %cst_12 = arith.constant 0.000000e+00 : f32
    %45 = vector.broadcast %cst_12 : f32 to vector<2x8x1xf32>
    %46 = arith.maximumf %44, %45 : vector<2x8x1xf32>
    %47 = vector.broadcast %40 : vector<2x8x1xf32> to vector<2x8x384xf32>
    %48 = arith.subf %30, %47 : vector<2x8x384xf32>
    %cst_13 = arith.constant 9.99999974E-6 : f32
    %49 = vector.broadcast %cst_13 : f32 to vector<2x8x1xf32>
    %50 = arith.addf %46, %49 : vector<2x8x1xf32>
    %51 = math.rsqrt %50 : vector<2x8x1xf32>
    %52 = vector.broadcast %51 : vector<2x8x1xf32> to vector<2x8x384xf32>
    %53 = arith.mulf %48, %52 : vector<2x8x384xf32>
    %c0_14 = arith.constant 0 : index
    %c0_15 = arith.constant 0 : index
    %c0_16 = arith.constant 0 : index
    %54 = vector.load %arg3[%c0_14, %c0_15, %c0_16] : memref<2x8x1xf32, #tpu.memory_space<vmem>>, vector<2x8x1xf32>
    %55 = vector.broadcast %54 : vector<2x8x1xf32> to vector<2x8x384xf32>
    %56 = arith.mulf %53, %55 : vector<2x8x384xf32>
    %c0_17 = arith.constant 0 : index
    %c0_18 = arith.constant 0 : index
    %c0_19 = arith.constant 0 : index
    %57 = vector.load %arg4[%c0_17, %c0_18, %c0_19] : memref<2x8x1xf32, #tpu.memory_space<vmem>>, vector<2x8x1xf32>
    %58 = vector.broadcast %57 : vector<2x8x1xf32> to vector<2x8x384xf32>
    %59 = arith.addf %56, %58 : vector<2x8x384xf32>
    %cst_20 = arith.constant 0.000000e+00 : f32
    %60 = vector.broadcast %cst_20 : f32 to vector<2x8x384xf32>
    %61 = arith.maximumf %59, %60 : vector<2x8x384xf32>
    %c0_21 = arith.constant 0 : index
    %c0_22 = arith.constant 0 : index
    %c0_23 = arith.constant 0 : index
    %62 = vector.load %arg6[%c0_21, %c0_22, %c0_23] : memref<2x8x384xf32, #tpu.memory_space<vmem>>, vector<2x8x384xf32>
    tpu.vector_store %arg6[%c0_21, %c0_22, %c0_23], %61 {strides = array<i32>} : memref<2x8x384xf32, #tpu.memory_space<vmem>>, vector<2x8x384xf32>,
    return
  }
  func.func @transform_0(%arg0: i32) -> (i32, i32, i32) {
    %c0_i32 = arith.constant 0 : i32
    %c0_i32_0 = arith.constant 0 : i32
    %c0_i32_1 = arith.constant 0 : i32
    return %arg0, %c0_i32, %c0_i32_0 : i32, i32, i32
  }
  func.func @transform_1(%arg0: i32) -> (i32, i32) {
    %c0_i32 = arith.constant 0 : i32
    %c0_i32_0 = arith.constant 0 : i32
    %c0_i32_1 = arith.constant 0 : i32
    return %c0_i32, %c0_i32_0 : i32, i32
  }
  func.func @transform_2(%arg0: i32) -> (i32, i32, i32) {
    %c0_i32 = arith.constant 0 : i32
    %c0_i32_0 = arith.constant 0 : i32
    %c0_i32_1 = arith.constant 0 : i32
    return %arg0, %c0_i32, %c0_i32_0 : i32, i32, i32
  }
  func.func @transform_3(%arg0: i32) -> (i32, i32, i32) {
    %c0_i32 = arith.constant 0 : i32
    %c0_i32_0 = arith.constant 0 : i32
    %c0_i32_1 = arith.constant 0 : i32
    return %arg0, %c0_i32, %c0_i32_0 : i32, i32, i32
  }
  func.func @transform_4(%arg0: i32) -> (i32, i32, i32) {
    %c0_i32 = arith.constant 0 : i32
    %c0_i32_0 = arith.constant 0 : i32
    %c0_i32_1 = arith.constant 0 : i32
    %c0_i32_2 = arith.constant 0 : i32
    return %c0_i32, %c0_i32_0, %c0_i32_1 : i32, i32, i32
  }
  func.func @transform_5(%arg0: i32) -> (i32, i32, i32) {
    %c0_i32 = arith.constant 0 : i32
    %c0_i32_0 = arith.constant 0 : i32
    %c0_i32_1 = arith.constant 0 : i32
    return %arg0, %c0_i32, %c0_i32_0 : i32, i32, i32
  }
}

</mosaic_0001>

<bundles_post_ra>
// kernel: tpu_custom_call.1
= control target key start
LH: loop header
LB: loop body
LE: loop exit
PB: predicated region body
PF: predicated region fallthrough
CT: control target
= control target key end

     0   :  { %s1582_s0 = inlined_call_operand.vmem [shape: bf16[2,4,512], index: 0, kind: input, shape index: {}]   ;;  %s1583_s1 = inlined_call_operand.vmem [shape: bf16[8,36], index: 1, kind: input, shape index: {}]   ;;  %s1584_s2 = inlined_call_operand.vmem [shape: f32[2,8,1], index: 2, kind: input, shape index: {}]   ;;  %s1585_s3 = inlined_call_operand.vmem [shape: f32[2,8,1], index: 3, kind: input, shape index: {}]   ;;  %s1586_s4 = inlined_call_operand.vmem [shape: f32[1,1,384], index: 4, kind: input, shape index: {}]   ;;  %s1587_s5 = inlined_call_operand.hbm [shape: f32[2,8,384], index: 5, kind: output, shape index: {}]  }
   0x1   :  { %v23_v0 = vld [vmem:[%s1582_s0] sm:$0xff]  ;;  %v24_v1 = vld [vmem:[%s1582_s0 + $0x8] sm:$0xff] }
   0x2   :  { %10 = vsyncpa [#allocation3], 0  ;;  %v1115_v2 = vunpack.c.h.bf16 %v23_v0  ;;  %v1117_v3 = vunpack.c.l.bf16 %v24_v1  ;;  %v1119_v4 = vunpack.c.h.bf16 %v24_v1  ;;  %v1121_v5 = vunpack.c.l.bf16 %v23_v0  ;;  %s1067_s0 = smov 127   ;;  %s1068_s22 = smov 126  }
   0x3   :  { %s1069_s23 = smov 110   ;;  %s1070_s24 = smov 109   ;;  %vm494_vm1 = vcmask 1043456   ;;  %vm583_vm9 = vcmask 1041408   ;;  %vm579_vm10 = vcmask 293888  }
   0x4   :  { %35 = vst [vmem:[#allocation1 + $0x10] ss:$2 sm:$0xff] %v1115_v2  ;;  %s1071_s25 = smov 108   ;;  %s1072_s26 = smov 92  }
   0x5   :  { %41 = vst [vmem:[#allocation1 + $0x20] ss:$2 sm:$0xff] %v1117_v3  ;;  %s1073_s27 = smov 91   ;;  %s1074_s28 = smov 90  }
   0x6   :  { %43 = vst [vmem:[#allocation1 + $0x30] ss:$2 sm:$0xff] %v1119_v4  ;;  %s854_s16 = sshll.u32 %s1587_s5, 4  ;;  %s1077_s17 = smov 384   ;;  %s855_s16 = int_to_ptr.hbm [resolvable:$true] %s854_s16 }
   0x7   :  { %33 = vst [vmem:[#allocation1] ss:$2 sm:$0xff] %v1121_v5  ;;  %s1078_s18 = smov 24  }
   0xb   :  { %v38_v6 = vld.sshfl [vmem:[#allocation1 + $0x10] sm:$0xff pattern:$0x75316420]  ;;  %v1127_v7 = vld.sshfl [vmem:[#allocation1 + $0x18] sm:$0xff pattern:$0x75316420] }
   0xc   :  { %v44_v8 = vld.sshfl [vmem:[#allocation1 + $0x20] sm:$0xff pattern:$0x75316420]  ;;  %v1129_v9 = vld.sshfl [vmem:[#allocation1 + $0x28] sm:$0xff pattern:$0x75316420] }
   0xd   :  { %89 = vst [vmem:[#allocation1 + $0x20] ss:$2 sm:$0xff] %v1117_v3  ;;  %v889_v10 = vpack.i.bf16 %v44_v8, %v38_v6  ;;  %v1132_v11 = vld.sshfl [vmem:[#allocation1 + $0x30] sm:$0xff pattern:$0x75316420] }
   0xe   :  { %83 = vst [vmem:[#allocation1 + $0x10] ss:$2 sm:$0xff] %v1115_v2  ;;  %v36_v12 = vld.sshfl [vmem:[#allocation1] sm:$0xff pattern:$0x75316420] }
   0xf   :  { %890 = vrot.lane.b32.xlu2 %v889_v10, %s1067_s0  ;;  %v37_v13 = vld.sshfl [vmem:[#allocation1 + $0x8] sm:$0xff pattern:$0x75316420]  ;;  %v1136_v14 = vld.sshfl [vmem:[#allocation1 + $0x38] sm:$0xff pattern:$0x75316420] }
  0x10   :  { %v884_v15 = vpack.i.bf16 %v37_v13, %v36_v12  ;;  %81 = vst [vmem:[#allocation1] ss:$2 sm:$0xff] %v1121_v5  ;;  %v994_v12 = vpack.i.bf16 %v1132_v11, %v1129_v9 }
  0x11   :  { %91 = vst [vmem:[#allocation1 + $0x30] ss:$2 sm:$0xff] %v1119_v4 }
  0x12   :  { %885 = vrot.lane.b32.xlu1 %v884_v15, %s1067_s0 }
  0x14   :  { %v92_v16 = vld.sshfl [vmem:[#allocation1 + $0x20] sm:$0xff pattern:$0x75316420]  ;;  %v1141_v17 = vld.sshfl [vmem:[#allocation1 + $0x28] sm:$0xff pattern:$0x75316420] }
  0x15   :  { %v86_v18 = vld.sshfl [vmem:[#allocation1 + $0x10] sm:$0xff pattern:$0x75316420]  ;;  %v1143_v19 = vld.sshfl [vmem:[#allocation1 + $0x18] sm:$0xff pattern:$0x75316420] }
  0x16   :  { %135 = vst [vmem:[#allocation1 + $0x20] ss:$2 sm:$0xff] %v1117_v3  ;;  %v899_v20 = vpack.i.bf16 %v92_v16, %v86_v18 }
  0x17   :  { %129 = vst [vmem:[#allocation1 + $0x10] ss:$2 sm:$0xff] %v1115_v2  ;;  %v84_v21 = vld.sshfl [vmem:[#allocation1] sm:$0xff pattern:$0x75316420] }
  0x18   :  { %900 = vrot.lane.b32.xlu0 %v899_v20, %s1068_s22  ;;  %v85_v22 = vld.sshfl [vmem:[#allocation1 + $0x8] sm:$0xff pattern:$0x75316420]  ;;  %v1148_v23 = vld.sshfl [vmem:[#allocation1 + $0x30] sm:$0xff pattern:$0x75316420] }
  0x19   :  { %v894_v24 = vpack.i.bf16 %v85_v22, %v84_v21  ;;  %127 = vst [vmem:[#allocation1] ss:$2 sm:$0xff] %v1121_v5  ;;  %v1151_v25 = vld.sshfl [vmem:[#allocation1 + $0x38] sm:$0xff pattern:$0x75316420]  ;;  %v1029_v11 = vpack.i.bf16 %v1148_v23, %v1141_v17 }
  0x1a   :  { %137 = vst [vmem:[#allocation1 + $0x30] ss:$2 sm:$0xff] %v1119_v4 }
  0x1b   :  { %895 = vrot.lane.b32.xlu2 %v894_v24, %s1068_s22 }
  0x1d   :  { %v138_v26 = vld.sshfl [vmem:[#allocation1 + $0x20] sm:$0xff pattern:$0x75316420]  ;;  %v1155_v27 = vld.sshfl [vmem:[#allocation1 + $0x28] sm:$0xff pattern:$0x75316420] }
  0x1e   :  { %v132_v28 = vld.sshfl [vmem:[#allocation1 + $0x10] sm:$0xff pattern:$0x75316420]  ;;  %v1157_v29 = vld.sshfl [vmem:[#allocation1 + $0x18] sm:$0xff pattern:$0x75316420] }
  0x1f   :  { %181 = vst [vmem:[#allocation1 + $0x20] ss:$2 sm:$0xff] %v1117_v3  ;;  %v909_v30 = vpack.i.bf16 %v138_v26, %v132_v28 }
  0x20   :  { %175 = vst [vmem:[#allocation1 + $0x10] ss:$2 sm:$0xff] %v1115_v2  ;;  %v130_v31 = vld.sshfl [vmem:[#allocation1] sm:$0xff pattern:$0x75316420] }
  0x21   :  { %910 = vrot.lane.b32.xlu1 %v909_v30, %s1069_s23  ;;  %v131_v32 = vld.sshfl [vmem:[#allocation1 + $0x8] sm:$0xff pattern:$0x75316420]  ;;  %v1162_v33 = vld.sshfl [vmem:[#allocation1 + $0x30] sm:$0xff pattern:$0x75316420] }
  0x22   :  { %v904_v34 = vpack.i.bf16 %v131_v32, %v130_v31  ;;  %173 = vst [vmem:[#allocation1] ss:$2 sm:$0xff] %v1121_v5  ;;  %v1165_v35 = vld.sshfl [vmem:[#allocation1 + $0x38] sm:$0xff pattern:$0x75316420] }
  0x23   :  { %183 = vst [vmem:[#allocation1 + $0x30] ss:$2 sm:$0xff] %v1119_v4 }
  0x24   :  { %905 = vrot.lane.b32.xlu0 %v904_v34, %s1069_s23 }
  0x26   :  { %v184_v36 = vld.sshfl [vmem:[#allocation1 + $0x20] sm:$0xff pattern:$0x75316420]  ;;  %v185_v37 = vld.sshfl [vmem:[#allocation1 + $0x28] sm:$0xff pattern:$0x75316420] }
  0x27   :  { %v178_v38 = vld.sshfl [vmem:[#allocation1 + $0x10] sm:$0xff pattern:$0x75316420]  ;;  %v1169_v39 = vld.sshfl [vmem:[#allocation1 + $0x18] sm:$0xff pattern:$0x75316420] }
  0x28   :  { %v919_v40 = vpack.i.bf16 %v184_v36, %v178_v38  ;;  %221 = vst [vmem:[#allocation1 + $0x10] ss:$2 sm:$0xff] %v1115_v2  ;;  %v999_v36 = vpack.i.bf16 %v1162_v33, %v1155_v27 }
  0x29   :  { %227 = vst [vmem:[#allocation1 + $0x20] ss:$2 sm:$0xff] %v1117_v3  ;;  %v176_v41 = vld.sshfl [vmem:[#allocation1] sm:$0xff pattern:$0x75316420] }
  0x2a   :  { %920 = vrot.lane.b32.xlu1 %v919_v40, %s1070_s24  ;;  %v186_v42 = vld.sshfl [vmem:[#allocation1 + $0x30] sm:$0xff pattern:$0x75316420]  ;;  %v1174_v43 = vld.sshfl [vmem:[#allocation1 + $0x38] sm:$0xff pattern:$0x75316420] }
  0x2b   :  { %229 = vst [vmem:[#allocation1 + $0x30] ss:$2 sm:$0xff] %v1119_v4  ;;  %v924_v44 = vpack.i.bf16 %v186_v42, %v185_v37  ;;  %v177_v45 = vld.sshfl [vmem:[#allocation1 + $0x8] sm:$0xff pattern:$0x75316420]  ;;  %v1024_v42 = vpack.i.bf16 %v1136_v14, %v1127_v7 }
  0x2c   :  { %v914_v46 = vpack.i.bf16 %v177_v45, %v176_v41  ;;  %219 = vst [vmem:[#allocation1] ss:$2 sm:$0xff] %v1121_v5 }
  0x2d   :  { %925 = vrot.lane.b32.xlu2 %v924_v44, %s1070_s24 }
  0x2e   :  { %915 = vrot.lane.b32.xlu0 %v914_v46, %s1070_s24 }
  0x2f   :  { %v225_v47 = vld.sshfl [vmem:[#allocation1 + $0x18] sm:$0xff pattern:$0x75316420]  ;;  %v224_v50 = vld.sshfl [vmem:[#allocation1 + $0x10] sm:$0xff pattern:$0x75316420] }
  0x30   :  { %v230_v48 = vld.sshfl [vmem:[#allocation1 + $0x20] sm:$0xff pattern:$0x75316420]  ;;  %v231_v49 = vld.sshfl [vmem:[#allocation1 + $0x28] sm:$0xff pattern:$0x75316420] }
  0x31   :  { %273 = vst [vmem:[#allocation1 + $0x20] ss:$2 sm:$0xff] %v1117_v3  ;;  %v934_v63 = vpack.i.bf16 %v230_v48, %v224_v50 }
  0x32   :  { %v232_v51 = vld.sshfl [vmem:[#allocation1 + $0x30] sm:$0xff pattern:$0x75316420]  ;;  %v233_v52 = vld.sshfl [vmem:[#allocation1 + $0x38] sm:$0xff pattern:$0x75316420] }
  0x33   :  { %v939_v53 = vpack.i.bf16 %v232_v51, %v231_v49  ;;  %275 = vst [vmem:[#allocation1 + $0x30] ss:$2 sm:$0xff] %v1119_v4  ;;  %v944_v54 = vpack.i.bf16 %v233_v52, %v225_v47  ;;  %v222_v55 = vld.sshfl [vmem:[#allocation1] sm:$0xff pattern:$0x75316420] }
  0x34   :  { %267 = vst [vmem:[#allocation1 + $0x10] ss:$2 sm:$0xff] %v1115_v2  ;;  %v223_v56 = vld.sshfl [vmem:[#allocation1 + $0x8] sm:$0xff pattern:$0x75316420] }
  0x35   :  { %940 = vrot.lane.b32.xlu2 %v939_v53, %s1071_s25  ;;  %v929_v57 = vpack.i.bf16 %v223_v56, %v222_v55  ;;  %265 = vst [vmem:[#allocation1] ss:$2 sm:$0xff] %v1121_v5 }
  0x36   :  { %945 = vrot.lane.b32.xlu0 %v944_v54, %s1071_s25 }
  0x37   :  { %930 = vrot.lane.b32.xlu1 %v929_v57, %s1071_s25 }
  0x38   :  { %v276_v58 = vld.sshfl [vmem:[#allocation1 + $0x20] sm:$0xff pattern:$0x75316420]  ;;  %v277_v59 = vld.sshfl [vmem:[#allocation1 + $0x28] sm:$0xff pattern:$0x75316420] }
  0x39   :  { %319 = vst [vmem:[#allocation1 + $0x20] ss:$2 sm:$0xff] %v1117_v3 }
  0x3a   :  { %v278_v60 = vld.sshfl [vmem:[#allocation1 + $0x30] sm:$0xff pattern:$0x75316420]  ;;  %v1185_v61 = vld.sshfl [vmem:[#allocation1 + $0x38] sm:$0xff pattern:$0x75316420] }
  0x3b   :  { %321 = vst [vmem:[#allocation1 + $0x30] ss:$2 sm:$0xff] %v1119_v4  ;;  %v270_v62 = vld.sshfl [vmem:[#allocation1 + $0x10] sm:$0xff pattern:$0x75316420]  ;;  %v959_v21 = vpack.i.bf16 %v278_v60, %v277_v59 }
  0x3c   :  { %v1188_v0 = vld.sshfl [vmem:[#allocation1 + $0x18] sm:$0xff pattern:$0x75316420]  ;;  %v954_v1 = vpack.i.bf16 %v276_v58, %v270_v62  ;;  %v268_v6 = vld.sshfl [vmem:[#allocation1] sm:$0xff pattern:$0x75316420] }
  0x3d   :  { %313 = vst [vmem:[#allocation1 + $0x10] ss:$2 sm:$0xff] %v1115_v2  ;;  %v269_v8 = vld.sshfl [vmem:[#allocation1 + $0x8] sm:$0xff pattern:$0x75316420] }
  0x3e   :  { %955 = vrot.lane.b32.xlu0 %v954_v1, %s1072_s26  ;;  %v949_v10 = vpack.i.bf16 %v269_v8, %v268_v6  ;;  %311 = vst [vmem:[#allocation1] ss:$2 sm:$0xff] %v1121_v5 }
  0x3f   :  { %935 = vrot.lane.b32.xlu1 %v934_v63, %s1071_s25 }
  0x40   :  { %950 = vrot.lane.b32.xlu2 %v949_v10, %s1072_s26  ;;  %v323_v13 = vld.sshfl [vmem:[#allocation1 + $0x28] sm:$0xff pattern:$0x75316420]  ;;  %v322_v15 = vld.sshfl [vmem:[#allocation1 + $0x20] sm:$0xff pattern:$0x75316420] }
  0x41   :  { %365 = vst [vmem:[#allocation1 + $0x20] ss:$2 sm:$0xff] %v1117_v3 }
  0x42   :  { %v324_v16 = vld.sshfl [vmem:[#allocation1 + $0x30] sm:$0xff pattern:$0x75316420]  ;;  %v325_v18 = vld.sshfl [vmem:[#allocation1 + $0x38] sm:$0xff pattern:$0x75316420] }
  0x43   :  { %v974_v20 = vpack.i.bf16 %v324_v16, %v323_v13  ;;  %367 = vst [vmem:[#allocation1 + $0x30] ss:$2 sm:$0xff] %v1119_v4 }
  0x44   :  { %v316_v22 = vld.sshfl [vmem:[#allocation1 + $0x10] sm:$0xff pattern:$0x75316420]  ;;  %v317_v24 = vld.sshfl [vmem:[#allocation1 + $0x18] sm:$0xff pattern:$0x75316420] }
  0x45   :  { %v314_v26 = vld.sshfl [vmem:[#allocation1] sm:$0xff pattern:$0x75316420]  ;;  %v315_v28 = vld.sshfl [vmem:[#allocation1 + $0x8] sm:$0xff pattern:$0x75316420]  ;;  %v969_v37 = vpack.i.bf16 %v322_v15, %v316_v22  ;;  %v979_v27 = vpack.i.bf16 %v325_v18, %v317_v24 }
  0x46   :  { %975 = vrot.lane.b32.xlu0 %v974_v20, %s1073_s27  ;;  %v964_v9 = vpack.i.bf16 %v315_v28, %v314_v26  ;;  %357 = vst [vmem:[#allocation1] ss:$2 sm:$0xff] %v1121_v5 }
  0x47   :  { %960 = vrot.lane.b32.xlu1 %v959_v21, %s1072_s26  ;;  %359 = vst [vmem:[#allocation1 + $0x10] ss:$2 sm:$0xff] %v1115_v2 }
  0x48   :  { %965 = vrot.lane.b32.xlu2 %v964_v9, %s1073_s27  ;;  %v369_v30 = vld.sshfl [vmem:[#allocation1 + $0x28] sm:$0xff pattern:$0x75316420]  ;;  %v368_v31 = vld.sshfl [vmem:[#allocation1 + $0x20] sm:$0xff pattern:$0x75316420] }
  0x49   :  { %410 = vst [vmem:[#allocation1 + $0x20] ss:$2 sm:$0xff] %v1117_v3 }
  0x4a   :  { %v370_v32 = vld.sshfl [vmem:[#allocation1 + $0x30] sm:$0xff pattern:$0x75316420]  ;;  %v371_v34 = vld.sshfl [vmem:[#allocation1 + $0x38] sm:$0xff pattern:$0x75316420] }
  0x4b   :  { %412 = vst [vmem:[#allocation1 + $0x30] ss:$2 sm:$0xff] %v1119_v4  ;;  %v1014_v3 = vpack.i.bf16 %v370_v32, %v369_v30 }
  0x4d   :  { %v360_v38 = vld.sshfl [vmem:[#allocation1] sm:$0xff pattern:$0x75316420]  ;;  %v361_v17 = vld.sshfl [vmem:[#allocation1 + $0x8] sm:$0xff pattern:$0x75316420] }
  0x4e   :  { %v984_v23 = vpack.i.bf16 %v361_v17, %v360_v38  ;;  %403 = vst [vmem:[#allocation1] ss:$2 sm:$0xff] %v1121_v5  ;;  %v362_v40 = vld.sshfl [vmem:[#allocation1 + $0x10] sm:$0xff pattern:$0x75316420]  ;;  %v1004_v5 = vpack.i.bf16 %v1174_v43, %v1169_v39  ;;  %v72_v43 = vlaneseq }
  0x4f   :  { %1000 = vrot.lane.b32.xlu1 %v999_v36, %s1069_s23  ;;  %v363_v41 = vld.sshfl [vmem:[#allocation1 + $0x18] sm:$0xff pattern:$0x75316420]  ;;  %v989_v33 = vpack.i.bf16 %v368_v31, %v362_v40 }
  0x50   :  { %970 = vrot.lane.b32.xlu2 %v969_v37, %s1073_s27  ;;  %985 = vrot.lane.b32.xlu0 %v984_v23, %s1074_s28  ;;  %405 = vst [vmem:[#allocation1 + $0x10] ss:$2 sm:$0xff] %v1115_v2  ;;  %v1019_v4 = vpack.i.bf16 %v371_v34, %v363_v41  ;;  %v1009_v2 = vpack.i.bf16 %v1185_v61, %v1188_v0  ;;  %v1237_v45 = vand.u32 127, %v72_v43 }
  0x52   :  { %vm74_vm0 = vcmp.lt.s32.totalorder %v1237_v45, 127  ;;  %vm166_vm2 = vcmp.lt.s32.totalorder %v1237_v45, 110  ;;  %vm120_vm3 = vcmp.lt.s32.totalorder %v1237_v45, 126  ;;  %vm258_vm4 = vcmp.lt.s32.totalorder %v1237_v45, 108 }
  0x53   :  { %vm350_vm5 = vcmp.lt.s32.totalorder %v1237_v45, 91  ;;  %vm212_vm6 = vcmp.lt.s32.totalorder %v1237_v45, 109  ;;  %vm304_vm7 = vcmp.lt.s32.totalorder %v1237_v45, 92  ;;  %vm396_vm8 = vcmp.lt.s32.totalorder %v1237_v45, 90 }
  0x55   :  { %v406_v54 = vld.sshfl [vmem:[#allocation1] sm:$0xff pattern:$0x75316420]  ;;  %v407_v55 = vld.sshfl [vmem:[#allocation1 + $0x8] sm:$0xff pattern:$0x75316420] }
  0x57   :  { %1015 = vrot.lane.b32.xlu1 %v1014_v3, %s1074_s28 }
  0x58   :  { %980 = vrot.lane.b32.xlu2 %v979_v27, %s1073_s27  ;;  %990 = vrot.lane.b32.xlu0 %v989_v33, %s1074_s28 }
  0x5f   :  { %1020 = vrot.lane.b32.xlu1 %v1019_v4, %s1074_s28 }
  0x60   :  { %1005 = vrot.lane.b32.xlu2 %v1004_v5, %s1070_s24  ;;  %995 = vrot.lane.b32.xlu0 %v994_v12, %s1067_s0 }
  0x67   :  { %1025 = vrot.lane.b32.xlu1 %v1024_v42, %s1067_s0 }
  0x68   :  { %1030 = vrot.lane.b32.xlu2 %v1029_v11, %s1068_s22  ;;  %1010 = vrot.lane.b32.xlu0 %v1009_v2, %s1072_s26 }
  0x69   :  { %v1231_v39 = vpop.permute.xlu2 %890 }
  0x6f   :  { %116 = vrot.lane.b32.xlu1 %v1143_v19, %s1068_s22  ;;  %v892_v19 = vunpack.i.l.bf16 %v1231_v39 }
  0x70   :  { %162 = vrot.lane.b32.xlu0 %v1157_v29, %s1069_s23  ;;  %164 = vrot.lane.b32.xlu2 %v1165_v35, %s1069_s23 }
  0x75   :  { %v896_v7 = vpop.permute.xlu2 %895 }
  0x76   :  { %v897_v52 = vunpack.i.l.bf16 %v896_v7  ;;  %v898_v57 = vunpack.i.h.bf16 %v896_v7 }
  0x78   :  { %118 = vrot.lane.b32.xlu0 %v1151_v25, %s1068_s22  ;;  %v125_v63 = vsel %vm120_vm3, %v897_v52, %v898_v57 }
  0x84   :  { %v886_v44 = vpop.permute.xlu1 %885 }
  0x85   :  { %v888_v29 = vunpack.i.h.bf16 %v886_v44  ;;  %v887_v47 = vunpack.i.l.bf16 %v886_v44 }
  0x87   :  { %v1235_v14 = vpop.permute.xlu2 %925  ;;  %v77_v25 = vsel %vm74_vm0, %v888_v29, %v892_v19  ;;  %v79_v48 = vsel %vm74_vm0, %v887_v47, %v888_v29 }
  0x88   :  { %v429_v50 = vrot.slane %v77_v25, 4  ;;  %v428_v51 = vrot.slane %v79_v48, 4  ;;  %v928_v3 = vunpack.i.h.bf16 %v1235_v14  ;;  %v927_v27 = vunpack.i.l.bf16 %v1235_v14 }
  0x89   :  { %v893_v25 = vunpack.i.h.bf16 %v1231_v39 }
  0x8a   :  { %v1239_v46 = vpop.permute.xlu0 %900  ;;  %v495_v61 = vsel %vm494_vm1, %v406_v54, %v428_v51  ;;  %v496_v62 = vsel %vm494_vm1, %v407_v55, %v429_v50  ;;  %v216_v48 = vsel %vm212_vm6, %v927_v27, %v928_v3 }
  0x8b   :  { %v902_v58 = vunpack.i.l.bf16 %v1239_v46  ;;  %v519_v13 = vpack.c.bf16 %v496_v62, %v495_v61  ;;  %v903_v50 = vunpack.i.h.bf16 %v1239_v46 }
  0x8d   :  { %v123_v12 = vsel %vm120_vm3, %v898_v57, %v902_v58  ;;  %v549_v21 = vunpack.c.l.b16 %v519_v13  ;;  %v550_v24 = vunpack.c.h.b16 %v519_v13 }
  0x8f   :  { %v1243_v35 = vpop.permute.xlu2 %940 }
  0x90   :  { %v943_v38 = vunpack.i.h.bf16 %v1243_v35  ;;  %v942_v17 = vunpack.i.l.bf16 %v1243_v35 }
  0x92   :  { %v262_v2 = vsel %vm258_vm4, %v942_v17, %v943_v38 }
  0x93   :  { %v1251_v49 = vpop.permute.xlu1 %910  ;;  %v468_v54 = vrot.slane %v262_v2, 4 }
  0x94   :  { %v912_v53 = vunpack.i.l.bf16 %v1251_v49 }
  0x96   :  { %v906_v56 = vpop.permute.xlu0 %905 }
  0x97   :  { %v908_v59 = vunpack.i.h.bf16 %v906_v56  ;;  %v907_v60 = vunpack.i.l.bf16 %v906_v56 }
  0x99   :  { %v169_v0 = vsel %vm166_vm2, %v908_v59, %v912_v53  ;;  %v171_v1 = vsel %vm166_vm2, %v907_v60, %v908_v59 }
  0x9a   :  { %v447_v6 = vrot.slane %v169_v0, 4  ;;  %v446_v8 = vrot.slane %v171_v1, 4  ;;  %v951_v10 = vpop.permute.xlu2 %950 }
  0x9b   :  { %v953_v4 = vunpack.i.h.bf16 %v951_v10  ;;  %v952_v5 = vunpack.i.l.bf16 %v951_v10 }
  0x9c   :  { %v501_v15 = vsel %vm494_vm1, %v125_v63, %v446_v8  ;;  %v502_v16 = vsel %vm494_vm1, %v123_v12, %v447_v6  ;;  %v1273_v20 = vpop.permute.xlu1 %920 }
  0x9d   :  { %v521_v18 = vpack.c.bf16 %v502_v16, %v501_v15  ;;  %v309_v55 = vsel %vm304_vm7, %v952_v5, %v953_v4  ;;  %v923_v56 = vunpack.i.h.bf16 %v1273_v20  ;;  %v922_v59 = vunpack.i.l.bf16 %v1273_v20 }
  0x9e   :  { %v913_v15 = vunpack.i.h.bf16 %v1251_v49 }
  0x9f   :  { %v552_v22 = vunpack.c.l.b16 %v521_v18  ;;  %v553_v26 = vunpack.c.h.b16 %v521_v18  ;;  %v218_v16 = vsel %vm212_vm6, %v923_v56, %v927_v27 }
  0xa0   :  { %v1275_v28 = vpop.permute.xlu0 %915 }
  0xa1   :  { %v1277_v9 = vpack.c.b16 %v552_v22, %v549_v21  ;;  %v1279_v11 = vpack.c.b16 %v553_v26, %v550_v24  ;;  %v918_v60 = vunpack.i.h.bf16 %v1275_v28  ;;  %v917_v63 = vunpack.i.l.bf16 %v1275_v28 }
  0xa2   :  { %v966_v30 = vpop.permute.xlu2 %965  ;;  %v511_v21 = vsel %vm494_vm1, %v216_v48, %v468_v54 }
  0xa3   :  { %v968_v23 = vunpack.i.h.bf16 %v966_v30  ;;  %v967_v40 = vunpack.i.l.bf16 %v966_v30 }
  0xa5   :  { %v355_v7 = vsel %vm350_vm5, %v967_v40, %v968_v23  ;;  %v217_v40 = vsel %vm212_vm6, %v917_v63, %v918_v60 }
  0xa6   :  { %v482_v61 = vrot.slane %v355_v7, 4 }
  0xa8   :  { %v1281_v31 = vpop.permute.xlu0 %945  ;;  %v513_v28 = vsel %vm494_vm1, %v309_v55, %v482_v61 }
  0xa9   :  { %v931_v32 = vpop.permute.xlu1 %930  ;;  %v948_v0 = vunpack.i.h.bf16 %v1281_v31 }
  0xaa   :  { %v1283_v34 = vpop.permute.xlu2 %970  ;;  %v933_v43 = vunpack.i.h.bf16 %v931_v32  ;;  %v932_v44 = vunpack.i.l.bf16 %v931_v32  ;;  %v215_v32 = vsel %vm212_vm6, %v918_v60, %v922_v59 }
  0xab   :  { %v972_v41 = vunpack.i.l.bf16 %v1283_v34  ;;  %v973_v8 = vunpack.i.h.bf16 %v1283_v34 }
  0xac   :  { %v263_v1 = vsel %vm258_vm4, %v932_v44, %v933_v43 }
  0xad   :  { %v353_v29 = vsel %vm350_vm5, %v968_v23, %v972_v41  ;;  %v464_v22 = vrot.slane %v263_v1, 4 }
  0xae   :  { %v483_v62 = vrot.slane %v353_v29, 4 }
  0xb0   :  { %v1285_v36 = vpop.permute.xlu0 %955 }
  0xb1   :  { %v1287_v37 = vpop.permute.xlu1 %935  ;;  %v957_v47 = vunpack.i.l.bf16 %v1285_v36  ;;  %v958_v48 = vunpack.i.h.bf16 %v1285_v36 }
  0xb2   :  { %v1296_v33 = vpop.permute.xlu2 %980  ;;  %v937_v42 = vunpack.i.l.bf16 %v1287_v37  ;;  %v938_v51 = vunpack.i.h.bf16 %v1287_v37  ;;  %v1352_v37 = vsel %vm258_vm4, %v943_v38, %v948_v0 }
  0xb3   :  { %v307_v6 = vsel %vm304_vm7, %v953_v4, %v957_v47  ;;  %v982_v24 = vunpack.i.l.bf16 %v1296_v33  ;;  %v983_v27 = vunpack.i.h.bf16 %v1296_v33  ;;  %v469_v44 = vrot.slane %v1352_v37, 4 }
  0xb4   :  { %v261_v57 = vsel %vm258_vm4, %v933_v43, %v937_v42  ;;  %v264_v10 = vsel %vm258_vm4, %v938_v51, %v942_v17  ;;  %v514_v30 = vsel %vm494_vm1, %v307_v6, %v483_v62  ;;  %v947_v17 = vunpack.i.l.bf16 %v1281_v31 }
  0xb5   :  { %v465_v12 = vrot.slane %v261_v57, 4  ;;  %v467_v23 = vrot.slane %v264_v10, 4  ;;  %v525_v33 = vpack.c.bf16 %v514_v30, %v513_v28  ;;  %v1376_v29 = vsel %vm350_vm5, %v972_v41, %v982_v24 }
  0xb6   :  { %v1365_v7 = vsel %vm258_vm4, %v937_v42, %v947_v17  ;;  %v484_v60 = vrot.slane %v1376_v29, 4 }
  0xb7   :  { %v508_v2 = vsel %vm494_vm1, %v215_v32, %v465_v12  ;;  %v510_v55 = vsel %vm494_vm1, %v218_v16, %v467_v23  ;;  %v466_v56 = vrot.slane %v1365_v7, 4  ;;  %v558_v63 = vunpack.c.l.b16 %v525_v33 }
  0xb8   :  { %v976_v35 = vpop.permute.xlu0 %975  ;;  %v559_v6 = vunpack.c.h.b16 %v525_v33 }
  0xb9   :  { %v1317_v52 = vpop.permute.xlu1 %960  ;;  %v977_v13 = vunpack.i.l.bf16 %v976_v35  ;;  %v978_v18 = vunpack.i.h.bf16 %v976_v35  ;;  %v507_v35 = vsel %vm494_vm1, %v217_v40, %v464_v22 }
  0xba   :  { %v1342_v26 = vpop.permute.xlu2 %1005  ;;  %v963_v38 = vunpack.i.h.bf16 %v1317_v52  ;;  %v962_v42 = vunpack.i.l.bf16 %v1317_v52  ;;  %v523_v54 = vpack.c.bf16 %v508_v2, %v507_v35 }
  0xbb   :  { %v356_v4 = vsel %vm350_vm5, %v973_v8, %v977_v13  ;;  %v354_v31 = vsel %vm350_vm5, %v977_v13, %v978_v18  ;;  %v1385_v57 = vsel %vm350_vm5, %v978_v18, %v983_v27  ;;  %v1008_v1 = vunpack.i.h.bf16 %v1342_v26 }
  0xbc   :  { %v485_v51 = vrot.slane %v356_v4, 4  ;;  %v486_v34 = vrot.slane %v354_v31, 4  ;;  %v308_v61 = vsel %vm304_vm7, %v962_v42, %v963_v38  ;;  %v310_v0 = vsel %vm304_vm7, %v958_v48, %v962_v42 }
  0xbd   :  { %v1397_v8 = vpack.c.bf16 %v511_v21, %v510_v55  ;;  %v487_v10 = vrot.slane %v1385_v57, 4  ;;  %v555_v12 = vunpack.c.l.b16 %v523_v54  ;;  %v556_v13 = vunpack.c.h.b16 %v523_v54 }
  0xbe   :  { %v516_v16 = vsel %vm494_vm1, %v310_v0, %v485_v51  ;;  %v517_v32 = vsel %vm494_vm1, %v308_v61, %v486_v34  ;;  %v1007_v4 = vunpack.i.l.bf16 %v1342_v26 }
  0xbf   :  { %v1419_v35 = vpack.c.bf16 %v517_v32, %v516_v16  ;;  %v567_v34 = vpack.c.b16 %v558_v63, %v555_v12  ;;  %v568_v61 = vpack.c.b16 %v559_v6, %v556_v13  ;;  %v648_v0 = vunpack.c.l.b16 %v1397_v8 }
  0xc1   :  { %v1360_v5 = vpop.permute.xlu1 %1000  ;;  %v651_v63 = vunpack.c.l.b16 %v1419_v35 }
  0xc2   :  { %v986_v43 = vpop.permute.xlu0 %985  ;;  %v1002_v41 = vunpack.i.l.bf16 %v1360_v5  ;;  %v1003_v62 = vunpack.i.h.bf16 %v1360_v5  ;;  %v1403_v22 = vpop.permute.xlu2 %1030 }
  0xc3   :  { %v988_v24 = vunpack.i.h.bf16 %v986_v43  ;;  %v987_v28 = vunpack.i.l.bf16 %v986_v43  ;;  %v1033_v17 = vunpack.i.h.bf16 %v1403_v22  ;;  %v1032_v33 = vunpack.i.l.bf16 %v1403_v22 }
  0xc4   :  { %v172_v18 = vsel %vm166_vm2, %v913_v15, %v1002_v41  ;;  %v170_v21 = vsel %vm166_vm2, %v1002_v41, %v1003_v62  ;;  %v214_v15 = vsel %vm212_vm6, %v928_v3, %v1008_v1  ;;  %v213_v41 = vsel %vm212_vm6, %v922_v59, %v1007_v4 }
  0xc5   :  { %v449_v43 = vrot.slane %v172_v18, 4  ;;  %v450_v48 = vrot.slane %v170_v21, 4  ;;  %v401_v14 = vsel %vm396_vm8, %v987_v28, %v988_v24  ;;  %v124_v26 = vsel %vm120_vm3, %v1032_v33, %v1033_v17 }
  0xc6   :  { %v649_v1 = vunpack.c.h.b16 %v1397_v8  ;;  %v126_v16 = vsel %vm120_vm3, %v903_v50, %v1032_v33  ;;  %v1447_v6 = vsel %vm494_vm1, %v214_v15, %v469_v44  ;;  %v413_v44 = vld.sshfl [vmem:[#allocation1 + $0x20] sm:$0xff pattern:$0x75316420] }
  0xc7   :  { %v504_v20 = vsel %vm494_vm1, %v126_v16, %v449_v43  ;;  %v505_v59 = vsel %vm494_vm1, %v124_v26, %v450_v48  ;;  %v509_v16 = vsel %vm494_vm1, %v213_v41, %v466_v56 }
  0xc9   :  { %v1016_v30 = vpop.permute.xlu1 %1015 }
  0xca   :  { %v1018_v23 = vunpack.i.h.bf16 %v1016_v30  ;;  %v1017_v40 = vunpack.i.l.bf16 %v1016_v30  ;;  %v991_v27 = vpop.permute.xlu0 %990 }
  0xcb   :  { %v993_v2 = vunpack.i.h.bf16 %v991_v27  ;;  %v992_v31 = vunpack.i.l.bf16 %v991_v27 }
  0xcc   :  { %v400_v42 = vsel %vm396_vm8, %v1017_v40, %v1018_v23 }
  0xcd   :  { %v399_v51 = vsel %vm396_vm8, %v988_v24, %v992_v31  ;;  %v402_v3 = vsel %vm396_vm8, %v993_v2, %v1017_v40 }
  0xce   :  { %v527_v54 = vpack.c.bf16 %v399_v51, %v401_v14  ;;  %v537_v55 = vpack.c.bf16 %v400_v42, %v402_v3 }
  0xd0   :  { %v561_v18 = vunpack.c.l.b16 %v527_v54  ;;  %v562_v24 = vunpack.c.h.b16 %v527_v54  ;;  %v654_v28 = vunpack.c.l.b16 %v537_v55  ;;  %v655_v2 = vunpack.c.h.b16 %v537_v55 }
  0xd1   :  { %v1021_v30 = vpop.permute.xlu1 %1020 }
  0xd2   :  { %v1023_v12 = vunpack.i.h.bf16 %v1021_v30  ;;  %v1022_v13 = vunpack.i.l.bf16 %v1021_v30  ;;  %v1449_v32 = vpop.permute.xlu0 %995  ;;  %v570_v50 = vpack.c.b16 %v561_v18, %v561_v18  ;;  %v571_v21 = vpack.c.b16 %v562_v24, %v562_v24  ;;  %v800_v18 = vld [vmem:[%s1584_s2] sm:$0xff] }
  0xd3   :  { %v998_v40 = vunpack.i.h.bf16 %v1449_v32  ;;  %v997_v27 = vunpack.i.l.bf16 %v1449_v32  ;;  %v663_v4 = vpack.c.b16 %v654_v28, %v654_v28  ;;  %v660_v24 = vpack.c.b16 %v651_v63, %v648_v0 }
  0xd4   :  { %v585_v43 = vsel %vm583_vm9, %v570_v50, 0  ;;  %v588_v33 = vsel %vm583_vm9, %v571_v21, 0  ;;  %v397_v37 = vsel %vm396_vm8, %v992_v31, %v1022_v13  ;;  %v398_v15 = vsel %vm396_vm8, %v1018_v23, %v1023_v12  ;;  %v414_v31 = vld.sshfl [vmem:[#allocation1 + $0x28] sm:$0xff pattern:$0x75316420] }
  0xd5   :  { %v78_v42 = vsel %vm74_vm0, %v997_v27, %v998_v40  ;;  %v80_v48 = vsel %vm74_vm0, %v893_v25, %v997_v27  ;;  %598 = vmatpush.bf16.msra.mxu0 %v585_v43  ;;  %611 = vmatpush.bf16.msra.mxu1 %v588_v33  ;;  %v673_v51 = vsel %vm583_vm9, %v663_v4, 0  ;;  %v528_v14 = vpack.c.bf16 %v397_v37, %v397_v37 }
  0xd6   :  { %v431_v3 = vrot.slane %v80_v48, 4  ;;  %v432_v26 = vrot.slane %v78_v42, 4  ;;  %686 = vmatpush.bf16.msra.mxu3 %v673_v51  ;;  %v531_v23 = vpack.c.bf16 %v505_v59, %v504_v20  ;;  %v538_v54 = vpack.c.bf16 %v398_v15, %v398_v15  ;;  %v408_v48 = vld.sshfl [vmem:[#allocation1 + $0x10] sm:$0xff pattern:$0x75316420] }
  0xd7   :  { %v563_v55 = vunpack.c.l.b16 %v528_v14  ;;  %v534_v25 = vpack.c.bf16 %v1447_v6, %v1447_v6  ;;  %v1075_v20 = vmov 0   ;;  %v664_v41 = vpack.c.b16 %v655_v2, %v655_v2 }
  0xd8   :  { %v498_v28 = vsel %vm494_vm1, %v413_v44, %v431_v3  ;;  %v499_v30 = vsel %vm494_vm1, %v414_v31, %v432_v26  ;;  %v656_v12 = vunpack.c.l.b16 %v538_v54  ;;  %1034 = vset.pattern.permute.xlu1 %v1075_v20  ;;  %1036 = vset.pattern.permute.xlu0 %v1075_v20  ;;  %v652_v6 = vunpack.c.h.b16 %v1419_v35 }
  0xd9   :  { %599 = vmatpush.bf16.msra.mxu0 %v567_v34  ;;  %612 = vmatpush.bf16.msra.mxu1 %v568_v61  ;;  %v1026_v7 = vpop.permute.xlu1 %1025  ;;  %v572_v56 = vpack.c.b16 %v563_v55, %v563_v55  ;;  %v529_v59 = vpack.c.bf16 %v499_v30, %v498_v28  ;;  %v645_v0 = vunpack.c.l.b16 %v531_v23  ;;  %v524_v21 = vpack.c.bf16 %v509_v16, %v509_v16 }
  0xda   :  { %687 = vmatpush.bf16.msra.mxu3 %v660_v24  ;;  %v1027_v13 = vunpack.i.l.bf16 %v1026_v7  ;;  %v1011_v50 = vpop.permute.xlu0 %1010  ;;  %v665_v63 = vpack.c.b16 %v656_v12, %v656_v12  ;;  %804 = vperm.xlu1 %1034, %v800_v18   ;;  %v646_v2 = vunpack.c.h.b16 %v531_v23  ;;  %v1028_v37 = vunpack.i.h.bf16 %v1026_v7 }
  0xdb   :  { %v1013_v27 = vunpack.i.h.bf16 %v1011_v50  ;;  %v1012_v4 = vunpack.i.l.bf16 %v1011_v50  ;;  %v591_v43 = vsel %vm583_vm9, %v572_v56, 0  ;;  %v642_v33 = vunpack.c.l.b16 %v529_v59  ;;  %1035 = vset.pattern.permute.xlu2 %v1075_v20  ;;  %v720_v50 = vld [vmem:[%s1586_s4] sm:$0x7] }
  0xdc   :  { %v75_v34 = vsel %vm74_vm0, %v892_v19, %v1027_v13  ;;  %624 = vmatpush.bf16.msra.mxu2 %v591_v43  ;;  %v679_v35 = vsel %vm583_vm9, %v665_v63, 0  ;;  %v643_v61 = vunpack.c.h.b16 %v529_v59  ;;  %v676_v39 = vsel %vm583_vm9, %v664_v41, 0  ;;  %v22_v19 = vld [vmem:[%s1583_s1] sm:$0xf] }
  0xdd   :  { %v306_v44 = vsel %vm304_vm7, %v963_v38, %v1013_v27  ;;  %v305_v15 = vsel %vm304_vm7, %v957_v47, %v1012_v4  ;;  %600 = vmatpush.bf16.msra.mxu0 %v1277_v9  ;;  %613 = vmatpush.bf16.msra.mxu1 %v1279_v11  ;;  %v430_v42 = vrot.slane %v75_v34, 4  ;;  %v657_v52 = vpack.c.b16 %v645_v0, %v642_v33 }
  0xde   :  { %v515_v36 = vsel %vm494_vm1, %v305_v15, %v484_v60  ;;  %v518_v9 = vsel %vm494_vm1, %v306_v44, %v487_v10  ;;  %v658_v38 = vpack.c.b16 %v646_v2, %v643_v61  ;;  %v661_v51 = vpack.c.b16 %v652_v6, %v649_v1 }
  0xdf   :  { %v526_v47 = vpack.c.bf16 %v515_v36, %v515_v36  ;;  %v536_v11 = vpack.c.bf16 %v518_v9, %v518_v9  ;;  %688 = vmatpush.bf16.msra.mxu3 %v657_v52  ;;  %v650_v14 = vunpack.c.l.b16 %v534_v25  ;;  %v76_v29 = vsel %vm74_vm0, %v998_v40, %v1028_v37  ;;  %v165_v40 = vpop.permute.xlu2 %164  ;;  %v415_v25 = vld.sshfl [vmem:[#allocation1 + $0x30] sm:$0xff pattern:$0x75316420] }
  0xe0   :  { %866 = vmatmul.msk.bf16.vlgmr.msra.gmra.mxu0 %vm579_vm10, %v22_v19  ;;  %867 = vmatmul.msk.bf16.vlgmr.msra.gmra.mxu1 %vm579_vm10, %v22_v19  ;;  %v557_v57 = vunpack.c.l.b16 %v524_v21  ;;  %v497_v26 = vsel %vm494_vm1, %v408_v48, %v430_v42  ;;  %v433_v23 = vrot.slane %v76_v29, 4  ;;  %v722_v0 = vperm.slane %v720_v50, 0 }
  0xe1   :  { %699 = vmatpush.bf16.msrb.mxu0 %v676_v39  ;;  %712 = vmatpush.bf16.msrb.mxu1 %v679_v35  ;;  %v560_v60 = vunpack.c.l.b16 %v526_v47  ;;  %v653_v10 = vunpack.c.l.b16 %v536_v11  ;;  %v117_v31 = vpop.permute.xlu1 %116  ;;  %v520_v16 = vpack.c.bf16 %v497_v26, %v497_v26  ;;  %v723_v63 = vperm.slane %v720_v50, 1  ;;  %v801_v26 = vld [vmem:[%s1584_s2 + $0x8] sm:$0xff]  ;;  %s1076_s2 = smov [#allocation2]  }
  0xe2   :  { %v163_v3 = vpop.permute.xlu0 %162  ;;  %869 = vmatmul.msk.bf16.vlgmr.msra.gmra.mxu3 %vm579_vm10, %v22_v19  ;;  %v121_v55 = vsel %vm120_vm3, %v902_v58, %v117_v31  ;;  %v500_v24 = vsel %vm494_vm1, %v415_v25, %v433_v23  ;;  %v724_v35 = vperm.slane %v720_v50, 2  ;;  %v818_v31 = vld [vmem:[%s1585_s3] sm:$0xff] }
  0xe3   :  { %v167_v8 = vsel %vm166_vm2, %v912_v53, %v163_v3  ;;  %v569_v1 = vpack.c.b16 %v560_v60, %v557_v57  ;;  %v662_v32 = vpack.c.b16 %v653_v10, %v650_v14  ;;  %v168_v53 = vsel %vm166_vm2, %v1003_v62, %v165_v40  ;;  %v819_v3 = vld [vmem:[%s1585_s3 + $0x8] sm:$0xff]  ;;  %s852_s3 = sshll.u32 %s1076_s2, 4  ;;  %s853_s3 = int_to_ptr.vmem [resolvable:$true] %s852_s3 }
  0xe4   :  { %v448_v54 = vrot.slane %v167_v8, 4  ;;  %v551_v28 = vunpack.c.l.b16 %v520_v16  ;;  %v451_v30 = vrot.slane %v168_v53, 4  ;;  %v530_v7 = vpack.c.bf16 %v500_v24, %v500_v24 }
  0xe5   :  { %700 = vmatpush.bf16.msrb.mxu0 %v661_v51  ;;  %625 = vmatpush.bf16.msra.mxu2 %v569_v1 }
  0xe6   :  { %713 = vmatpush.bf16.msrb.mxu1 %v662_v32  ;;  %v503_v49 = vsel %vm494_vm1, %v121_v55, %v448_v54  ;;  %v644_v41 = vunpack.c.l.b16 %v530_v7 }
  0xe7   :  { %v522_v18 = vpack.c.bf16 %v503_v49, %v503_v49 }
  0xe9   :  { %701 = vmatpush.bf16.msrb.mxu0 %v658_v38  ;;  %v554_v46 = vunpack.c.l.b16 %v522_v18 }
  0xea   :  { %v119_v12 = vpop.permute.xlu0 %118 }
  0xeb   :  { %v122_v58 = vsel %vm120_vm3, %v1033_v17, %v119_v12  ;;  %v566_v20 = vpack.c.b16 %v554_v46, %v551_v28 }
  0xec   :  { %v506_v56 = vsel %vm494_vm1, %v122_v58, %v451_v30 }
  0xed   :  { %626 = vmatpush.bf16.msra.mxu2 %v566_v20  ;;  %v532_v5 = vpack.c.bf16 %v506_v56, %v506_v56 }
  0xef   :  { %v647_v62 = vunpack.c.l.b16 %v532_v5 }
  0xf0   :  { %868 = vmatmul.msk.bf16.vlgmr.msra.gmra.mxu2 %vm579_vm10, %v22_v19  ;;  %870 = vmatmul.msk.bf16.vlgmr.msrb.gmra.mxu0 %vm579_vm10, %v22_v19 }
  0xf1   :  { %v659_v59 = vpack.c.b16 %v647_v62, %v644_v41 }
  0xf3   :  { %714 = vmatpush.bf16.msrb.mxu1 %v659_v59 }
  0xf6   :  { %871 = vmatmul.msk.bf16.vlgmr.msrb.gmra.mxu1 %vm579_vm10, %v22_v19 }
 0x14c   :  { %v805_v8 = vpop.permute.xlu1 %804 }
 0x15d   :  { %v1537_v22 = vpop.f32.mrf.mxu0  ;;  %v1539_v45 = vpop.f32.mrf.mxu1 }
 0x15e   :  { %v728_v27 = vmul.f32 %v722_v0, %v1537_v22  ;;  %v729_v4 = vmul.f32 %v723_v63, %v1539_v45 }
 0x160   :  { %v742_v61 = vmul.f32 %v728_v27, %v1537_v22  ;;  %v743_v2 = vmul.f32 %v729_v4, %v1539_v45  ;;  %v734_v19 = vadd.f32 %v729_v4, %v728_v27 }
 0x162   :  { %v748_v11 = vadd.f32 %v743_v2, %v742_v61 }
 0x165   :  { %v604_v17 = vpop.f32.mrf.mxu0  ;;  %v617_v6 = vpop.f32.mrf.mxu1 }
 0x166   :  { %v1541_v13 = vpop.f32.mrf.mxu3 }
 0x167   :  { %v731_v33 = vmul.f32 %v722_v0, %v1541_v13 }
 0x169   :  { %v745_v38 = vmul.f32 %v731_v33, %v1541_v13 }
 0x16d   :  { %v1546_v21 = vpop.f32.mrf.mxu0 }
 0x16e   :  { %v692_v43 = vpop.f32.mrf.mxu3  ;;  %v732_v34 = vmul.f32 %v723_v63, %v1546_v21 }
 0x170   :  { %v738_v37 = vadd.f32 %v732_v34, %v731_v33  ;;  %v746_v48 = vmul.f32 %v732_v34, %v1546_v21 }
 0x172   :  { %v752_v60 = vadd.f32 %v746_v48, %v745_v38 }
 0x173   :  { %v1554_v44 = vpop.f32.mrf.mxu2  ;;  %v1556_v15 = vpop.f32.mrf.mxu1 }
 0x174   :  { %v730_v39 = vmul.f32 %v724_v35, %v1554_v44  ;;  %v733_v42 = vmul.f32 %v724_v35, %v1556_v15 }
 0x175   :  { %v705_v52 = vpop.f32.mrf.mxu0 }
 0x176   :  { %v735_v36 = vadd.f32 %v734_v19, %v730_v39  ;;  %v739_v9 = vadd.f32 %v738_v37, %v733_v42  ;;  %v744_v47 = vmul.f32 %v730_v39, %v1554_v44  ;;  %v747_v14 = vmul.f32 %v733_v42, %v1556_v15 }
 0x178   :  { %736 = vadd.xlane.f32.xlu1 %v735_v36  ;;  %740 = vadd.xlane.f32.xlu2 %v739_v9  ;;  %v749_v51 = vadd.f32 %v748_v11, %v744_v47  ;;  %v753_v10 = vadd.f32 %v752_v60, %v747_v14 }
 0x17a   :  { %750 = vadd.xlane.f32.xlu0 %v749_v51 }
 0x17b   :  { %v630_v29 = vpop.f32.mrf.mxu2  ;;  %v718_v57 = vpop.f32.mrf.mxu1 }
 0x180   :  { %754 = vadd.xlane.f32.xlu2 %v753_v10 }
 0x18e   :  { %822 = vperm.xlu0 %1036, %v818_v31  }
 0x191   :  { %827 = vperm.xlu1 %1034, %v819_v3  }
 0x198   :  { %809 = vperm.xlu2 %1035, %v801_v26  }
 0x1eb   :  { %v737_v1 = vpop.xlane.xlu1 %736  ;;  %v741_v32 = vpop.xlane.xlu2 %740 }
 0x1ec   :  { %v756_v40 = vmul.f32 0.00390625, %v737_v1  ;;  %v757_v16 = vmul.f32 0.00390625, %v741_v32 }
 0x1ed   :  { %v751_v23 = vpop.xlane.xlu0 %750 }
 0x1ee   :  { %v758_v54 = vmul.f32 0.00390625, %v751_v23  ;;  %v760_v55 = vmul.f32 %v756_v40, %v756_v40  ;;  %v761_v24 = vmul.f32 %v757_v16, %v757_v16  ;;  %v766_v6 = vsub.f32 %v1537_v22, %v756_v40 }
 0x1ef   :  { %v767_v50 = vsub.f32 %v1539_v45, %v756_v40  ;;  %v768_v0 = vsub.f32 %v1554_v44, %v756_v40  ;;  %v769_v45 = vsub.f32 %v1541_v13, %v757_v16  ;;  %v770_v44 = vsub.f32 %v1546_v21, %v757_v16 }
 0x1f0   :  { %v762_v25 = vsub.f32 %v758_v54, %v760_v55  ;;  %v771_v52 = vsub.f32 %v1556_v15, %v757_v16 }
 0x1f2   :  { %v764_v49 = vmax.f32 %v762_v25, 0.0 }
 0x1f3   :  { %v755_v53 = vpop.xlane.xlu2 %754 }
 0x1f4   :  { %v772_v18 = vadd.f32 1e-05, %v764_v49  ;;  %v759_v28 = vmul.f32 0.00390625, %v755_v53 }
 0x1f6   :  { %1037 = vrsqrt.f32 %v772_v18  ;;  %v763_v46 = vsub.f32 %v759_v28, %v761_v24  ;;  %vm780_vm12 = vweird.f32 %v772_v18 }
 0x1f8   :  { %v765_v30 = vmax.f32 %v763_v46, 0.0 }
 0x1fa   :  { %v773_v12 = vadd.f32 1e-05, %v765_v30 }
 0x1fb   :  { %v810_v9 = vpop.permute.xlu2 %809 }
 0x1fc   :  { %v1038_v58 = vpop.eup %1037  ;;  %1039 = vrsqrt.f32 %v773_v12  ;;  %vm790_vm15 = vweird.f32 %v773_v12 }
 0x1fd   :  { %v775_v20 = vmul.f32 %v1038_v58, %v772_v18  ;;  %vm781_vm11 = vweird.f32 %v1038_v58 }
 0x1fe   :  { %vm782_vm13 = vmor %vm780_vm12, %vm781_vm11 }
 0x1ff   :  { %v776_v7 = vmul.f32 %v1038_v58, %v775_v20 }
 0x200   :  { %v823_v35 = vpop.permute.xlu0 %822 }
 0x201   :  { %v777_v56 = vmul.f32 0.5, %v776_v7 }
 0x202   :  { %v1040_v5 = vpop.eup %1039 }
 0x203   :  { %v778_v41 = vsub.f32 1.5, %v777_v56  ;;  %v785_v62 = vmul.f32 %v1040_v5, %v773_v12  ;;  %vm791_vm14 = vweird.f32 %v1040_v5  ;;  %v828_v57 = vpop.permute.xlu1 %827 }
 0x204   :  { %vm792_vm0 = vmor %vm790_vm15, %vm791_vm14 }
 0x205   :  { %v786_v59 = vmul.f32 %v1040_v5, %v785_v62  ;;  %v779_v17 = vmul.f32 %v1038_v58, %v778_v41 }
 0x207   :  { %v787_v63 = vmul.f32 0.5, %v786_v59  ;;  %v783_v27 = vsel %vm782_vm13, %v1038_v58, %v779_v17 }
 0x208   :  { %v794_v4 = vmul.f32 %v783_v27, %v766_v6  ;;  %v795_v43 = vmul.f32 %v783_v27, %v767_v50  ;;  %v796_v33 = vmul.f32 %v783_v27, %v768_v0 }
 0x209   :  { %v788_v34 = vsub.f32 1.5, %v787_v63 }
 0x20a   :  { %v812_v61 = vmul.f32 %v805_v8, %v794_v4  ;;  %v813_v2 = vmul.f32 %v805_v8, %v795_v43  ;;  %v814_v37 = vmul.f32 %v805_v8, %v796_v33 }
 0x20b   :  { %v789_v39 = vmul.f32 %v1040_v5, %v788_v34 }
 0x20c   :  { %v830_v19 = vadd.f32 %v823_v35, %v812_v61  ;;  %v831_v42 = vadd.f32 %v823_v35, %v813_v2  ;;  %v832_v22 = vadd.f32 %v823_v35, %v814_v37 }
 0x20d   :  { %v793_v36 = vsel %vm792_vm0, %v1040_v5, %v789_v39 }
 0x20e   :  { %v836_v47 = vmax.f32 %v830_v19, 0.0  ;;  %v837_v11 = vmax.f32 %v831_v42, 0.0  ;;  %v838_v38 = vmax.f32 %v832_v22, 0.0  ;;  %v797_v48 = vmul.f32 %v793_v36, %v769_v45 }
 0x20f   :  { %v798_v51 = vmul.f32 %v793_v36, %v770_v44  ;;  %v799_v14 = vmul.f32 %v793_v36, %v771_v52 }
 0x210   :  { %842 = vst [vmem:[#allocation2] sm:$0xff] %v836_v47  ;;  %v815_v29 = vmul.f32 %v810_v9, %v797_v48 }
 0x211   :  { %843 = vst [vmem:[#allocation2 + $0x8] sm:$0xff] %v837_v11  ;;  %v816_v60 = vmul.f32 %v810_v9, %v798_v51  ;;  %v817_v10 = vmul.f32 %v810_v9, %v799_v14 }
 0x212   :  { %844 = vst [vmem:[#allocation2 + $0x10] sm:$0xff] %v838_v38  ;;  %v833_v13 = vadd.f32 %v828_v57, %v815_v29 }
 0x213   :  { %v834_v21 = vadd.f32 %v828_v57, %v816_v60  ;;  %v835_v15 = vadd.f32 %v828_v57, %v817_v10 }
 0x214   :  { %v839_v31 = vmax.f32 %v833_v13, 0.0 }
 0x215   :  { %v840_v3 = vmax.f32 %v834_v21, 0.0  ;;  %v841_v26 = vmax.f32 %v835_v15, 0.0 }
 0x216   :  { %845 = vst [vmem:[#allocation2 + $0x18] sm:$0xff] %v839_v31 }
 0x217   :  { %846 = vst [vmem:[#allocation2 + $0x20] sm:$0xff] %v840_v3 }
 0x218   :  { %847 = vst [vmem:[#allocation2 + $0x28] sm:$0xff] %v841_v26 }
 0x219   :  { %860 = dma.vmem_to_hbm [thread:$0]  %s853_s3, 768, %s855_s16, [#allocation3], %s1077_s17, %s1077_s17, %s1078_s18  }
 0x21a   :  { %1065 = dma.done.wait [#allocation3], 768  }
 0x21b   :  { %1066 = vsyncadd [#allocation3], 4294966528 }
 0x21c   :  { %865 = vsyncpa [#allocation3], 1 }

</bundles_post_ra>
